<compile_context>
chip_gen: v5e
topology: v5e:2x2
jax: 0.10.0
libtpu: 0.0.40
codegen_flags: <defaults>
</compile_context>

<pallas_src>
import functools
import math

import jax
import jax.numpy as jnp
from jax import lax
from jax.experimental import pallas as pl
from jax.experimental.pallas import tpu as pltpu

LANES = 128
SUBLANES = 8
_MAX_TILE_BYTES = 4 * 1024 * 1024      # per-input, per-pipeline-buffer budget
_VMEM_LIMIT_BYTES = 32 * 1024 * 1024   # 2 inputs x 2 bufs x 4 MiB + headroom
_ACC_ROWS_MAX = 64                     # up to 8 independent f32 vreg add chains
_SPLIT_MIN_TILES = 8                   # enable the 2-way core split threshold


def _awl_kernel(pred_ref, tgt_ref, abs_out_ref, sq_out_ref, *,
                rows, tile_rows, acc_rows, inner_steps, need_row_mask):
    s = pl.program_id(0)          # core-split axis ("parallel")
    i = pl.program_id(1)          # streaming / reduction axis ("arbitrary")

    @pl.when(i == 0)
    def _init():
        abs_out_ref[...] = jnp.zeros_like(abs_out_ref)
        sq_out_ref[...] = jnp.zeros_like(sq_out_ref)

    # Stream at input width; upcast after the load (cheap VPU op).
    p = pred_ref[...].astype(jnp.float32)
    t = tgt_ref[...].astype(jnp.float32)
    d = p - t
    abs_d = jnp.abs(d)
    sq_d = d * d

    folds = tile_rows // acc_rows

    def _accumulate(a, q):
        # Fold the (tile_rows, 128) tile into (acc_rows, 128) partials with
        # pure VPU elementwise adds -- no cross-lane/sublane reduction per
        # step, and acc_rows/8 independent vreg accumulation chains.
        abs_out_ref[...] += a.reshape(folds, acc_rows, LANES).sum(axis=0)[None]
        sq_out_ref[...] += q.reshape(folds, acc_rows, LANES).sum(axis=0)[None]

    if need_row_mask:
        # Only the globally-last tile can overhang the slab; keep the
        # iota/compare/select work out of every other step's trace.
        is_last = jnp.logical_and(s == pl.num_programs(0) - 1,
                                  i == pl.num_programs(1) - 1)

        @pl.when(jnp.logical_not(is_last))
        def _unmasked():
            _accumulate(abs_d, sq_d)

        @pl.when(is_last)
        def _masked():
            origin = (s * inner_steps + i) * tile_rows   # nominal block origin
            row_idx = origin + lax.broadcasted_iota(
                jnp.int32, (tile_rows, LANES), 0)
            valid = row_idx < rows
            _accumulate(jnp.where(valid, abs_d, 0.0),
                        jnp.where(valid, sq_d, 0.0))
    else:
        _accumulate(abs_d, sq_d)


def adaptive_weighted_loss(pred, target, alpha, *, _max_tile_rows=None):
    """Returns scalar float32 loss, matching the PyTorch module's forward.

    `_max_tile_rows` is a test-only knob to exercise the multi-tile, ragged
    tail and core-split code paths at small input sizes.
    """
    assert pred.shape == target.shape and pred.dtype == target.dtype
    n_elems = pred.size

    # Flatten (no dtype cast -- stream at input width, upcast in-kernel).
    p = pred.reshape(-1)
    t = target.reshape(-1)

    # Dtype-aware sublane pack: 8 rows (f32), 16 (bf16), 32 (int8/fp8).
    itemsize = jnp.dtype(pred.dtype).itemsize
    pack = SUBLANES * max(1, 4 // itemsize)
    quantum = pack * LANES

    # Pad only to the next pack*128 boundary.  Zero padding contributes 0 to
    # both |d| and d^2, and we divide by the true element count.  For the
    # shipped shape this is a no-op (2048 elements == 16 x 128 exactly).
    if n_elems % quantum != 0:
        padn = quantum - (n_elems % quantum)
        p = jnp.pad(p, (0, padn))
        t = jnp.pad(t, (0, padn))
    rows = p.size // LANES                      # multiple of `pack`
    p2d = p.reshape(rows, LANES)
    t2d = t.reshape(rows, LANES)

    # Largest tile inside the per-buffer VMEM budget (dtype aware); for small
    # inputs the grid collapses to a single step.
    max_tile_rows = _MAX_TILE_BYTES // (LANES * itemsize)
    if _max_tile_rows is not None:
        max_tile_rows = min(max_tile_rows, _max_tile_rows)
    max_tile_rows = max(pack, max_tile_rows - max_tile_rows % pack)
    tile_rows = min(max_tile_rows, rows)

    total_tiles = pl.cdiv(rows, tile_rows)
    need_row_mask = (rows % tile_rows) != 0

    # Two-way split along a leading "parallel" grid axis (uses both v7x
    # TensorCores for large inputs; near-zero cost on single-TC chips).
    num_splits = 2 if (total_tiles >= _SPLIT_MIN_TILES
                       and total_tiles % 2 == 0) else 1
    inner_steps = total_tiles // num_splits

    # Wide accumulator (multiple of 8, divides tile_rows, capped at 64 rows).
    acc_rows = math.gcd(tile_rows, _ACC_ROWS_MAX)

    kernel = functools.partial(
        _awl_kernel,
        rows=rows, tile_rows=tile_rows, acc_rows=acc_rows,
        inner_steps=inner_steps, need_row_mask=need_row_mask)

    part_shape = jax.ShapeDtypeStruct((num_splits, acc_rows, LANES), jnp.float32)
    abs_part, sq_part = pl.pallas_call(
        kernel,
        out_shape=(part_shape, part_shape),
        grid=(num_splits, inner_steps),
        in_specs=[
            pl.BlockSpec((tile_rows, LANES),
                         lambda s, i: (s * inner_steps + i, 0)),   # pred
            pl.BlockSpec((tile_rows, LANES),
                         lambda s, i: (s * inner_steps + i, 0)),   # target
        ],
        out_specs=(
            pl.BlockSpec((1, acc_rows, LANES), lambda s, i: (s, 0, 0)),
            pl.BlockSpec((1, acc_rows, LANES), lambda s, i: (s, 0, 0)),
        ),
        compiler_params=pltpu.CompilerParams(
            dimension_semantics=("parallel", "arbitrary"),
            vmem_limit_bytes=_VMEM_LIMIT_BYTES,
        ),
    )(p2d, t2d)

    # O(1) finalize in the wrapper: combine the tiny per-core partial blocks,
    # divide by N and do the sigmoid blend (a handful of XLA scalar ops).
    inv_n = jnp.float32(1.0 / n_elems)
    mae = jnp.sum(abs_part) * inv_n
    mse = jnp.sum(sq_part) * inv_n
    sig = jax.nn.sigmoid(jnp.asarray(alpha, dtype=jnp.float32))
    return sig * mae + (1.0 - sig) * mse


def _reference(pred, target, alpha):
    d = pred.astype(jnp.float32) - target.astype(jnp.float32)
    mae = jnp.mean(jnp.abs(d))
    mse = jnp.mean(d * d)
    sig = jax.nn.sigmoid(jnp.float32(alpha))
    return sig * mae + (1.0 - sig) * mse


if __name__ == "__main__":
    key = jax.random.PRNGKey(0)
    k1, k2 = jax.random.split(key)

    # NCHW inputs (as a conv-style model head would produce).
    pred = jax.random.normal(k1, (2, 4, 16, 16), dtype=jnp.float32)
    target = jax.random.normal(k2, (2, 4, 16, 16), dtype=jnp.float32)

    # Deterministic parameter init, matching nn.Parameter(torch.tensor(0.5)).
    alpha = 0.5

    loss = adaptive_weighted_loss(pred, target, alpha)
    loss = jax.block_until_ready(loss)
    ref = _reference(pred, target, alpha)
    assert jnp.allclose(loss, ref, rtol=1e-5, atol=1e-5), (loss, ref)

    # Exercise the ragged-tail (masked last tile) path at small size via the
    # test-only tile override: 3315 elems -> 32 rows, 24-row tiles.
    k3, k4 = jax.random.split(k1)
    pred2 = jax.random.normal(k3, (3, 5, 17, 13), dtype=jnp.float32)
    target2 = jax.random.normal(k4, (3, 5, 17, 13), dtype=jnp.float32)
    loss2 = jax.block_until_ready(
        adaptive_weighted_loss(pred2, target2, -0.3, _max_tile_rows=24))
    ref2 = _reference(pred2, target2, -0.3)
    assert jnp.allclose(loss2, ref2, rtol=1e-5, atol=1e-5), (loss2, ref2)

    # Exercise the 2-way "parallel" core-split path at small size:
    # 8192 elems -> 64 rows, 8-row tiles -> 8 tiles -> 2 splits x 4 steps.
    k5, k6 = jax.random.split(k2)
    pred3 = jax.random.normal(k5, (2, 4, 32, 32), dtype=jnp.float32)
    target3 = jax.random.normal(k6, (2, 4, 32, 32), dtype=jnp.float32)
    loss3 = jax.block_until_ready(
        adaptive_weighted_loss(pred3, target3, 1.25, _max_tile_rows=8))
    ref3 = _reference(pred3, target3, 1.25)
    assert jnp.allclose(loss3, ref3, rtol=1e-5, atol=1e-5), (loss3, ref3)

    print("KERNEL_OK")
</pallas_src>

<mosaic_0001>
module attributes {stable_mosaic.version = 11 : i64} {
  func.func @_awl_kernel(%arg0: i32, %arg1: i32, %arg2: memref<16x128xf32, #tpu.memory_space<vmem>>, %arg3: memref<16x128xf32, #tpu.memory_space<vmem>>, %arg4: memref<1x16x128xf32, #tpu.memory_space<vmem>>, %arg5: memref<1x16x128xf32, #tpu.memory_space<vmem>>) attributes {dimension_semantics = [#tpu.dimension_semantics<parallel>, #tpu.dimension_semantics<arbitrary>], iteration_bounds = array<i64: 1, 1>, scalar_prefetch = 0 : i64, scratch_operands = 0 : i64, tpu.core_type = #tpu.core_type<tc>, window_params = [{transform_indices = @transform_0, window_bounds = array<i64: 16, 128>}, {transform_indices = @transform_1, window_bounds = array<i64: 16, 128>}, {transform_indices = @transform_2, window_bounds = array<i64: 1, 16, 128>}, {transform_indices = @transform_3, window_bounds = array<i64: 1, 16, 128>}]} {
    %c0_i32 = arith.constant 0 : i32
    %0 = arith.cmpi eq, %arg1, %c0_i32 : i32
    %1 = arith.extui %0 : i1 to i32
    %c0_i32_0 = arith.constant 0 : i32
    %2 = arith.cmpi ne, %1, %c0_i32_0 : i32
    scf.if %2 {
      %cst_17 = arith.constant 0.000000e+00 : f32
      %20 = vector.broadcast %cst_17 : f32 to vector<1x16x128xf32>
      %c0_18 = arith.constant 0 : index
      %c0_19 = arith.constant 0 : index
      %c0_20 = arith.constant 0 : index
      %21 = vector.load %arg4[%c0_18, %c0_19, %c0_20] : memref<1x16x128xf32, #tpu.memory_space<vmem>>, vector<1x16x128xf32>
      tpu.vector_store %arg4[%c0_18, %c0_19, %c0_20], %20 {strides = array<i32>} : memref<1x16x128xf32, #tpu.memory_space<vmem>>, vector<1x16x128xf32>,
      %cst_21 = arith.constant 0.000000e+00 : f32
      %22 = vector.broadcast %cst_21 : f32 to vector<1x16x128xf32>
      %c0_22 = arith.constant 0 : index
      %c0_23 = arith.constant 0 : index
      %c0_24 = arith.constant 0 : index
      %23 = vector.load %arg5[%c0_22, %c0_23, %c0_24] : memref<1x16x128xf32, #tpu.memory_space<vmem>>, vector<1x16x128xf32>
      tpu.vector_store %arg5[%c0_22, %c0_23, %c0_24], %22 {strides = array<i32>} : memref<1x16x128xf32, #tpu.memory_space<vmem>>, vector<1x16x128xf32>,
    } else {
    }
    %c0 = arith.constant 0 : index
    %c0_1 = arith.constant 0 : index
    %3 = vector.load %arg2[%c0, %c0_1] : memref<16x128xf32, #tpu.memory_space<vmem>>, vector<16x128xf32>
    %c0_2 = arith.constant 0 : index
    %c0_3 = arith.constant 0 : index
    %4 = vector.load %arg3[%c0_2, %c0_3] : memref<16x128xf32, #tpu.memory_space<vmem>>, vector<16x128xf32>
    %5 = arith.subf %3, %4 : vector<16x128xf32>
    %6 = math.absf %5 : vector<16x128xf32>
    %7 = arith.mulf %5, %5 : vector<16x128xf32>
    %c0_4 = arith.constant 0 : index
    %c0_5 = arith.constant 0 : index
    %c0_6 = arith.constant 0 : index
    %8 = vector.load %arg4[%c0_4, %c0_5, %c0_6] : memref<1x16x128xf32, #tpu.memory_space<vmem>>, vector<1x16x128xf32>
    %9 = vector.shape_cast %6 : vector<16x128xf32> to vector<1x16x128xf32>
    %cst = arith.constant dense<0.000000e+00> : vector<16x128xf32>
    %10 = vector.multi_reduction <add>, %9, %cst [0] : vector<1x16x128xf32> to vector<16x128xf32>
    %11 = vector.shape_cast %10 : vector<16x128xf32> to vector<1x16x128xf32>
    %12 = arith.addf %8, %11 : vector<1x16x128xf32>
    %c0_7 = arith.constant 0 : index
    %c0_8 = arith.constant 0 : index
    %c0_9 = arith.constant 0 : index
    %13 = vector.load %arg4[%c0_7, %c0_8, %c0_9] : memref<1x16x128xf32, #tpu.memory_space<vmem>>, vector<1x16x128xf32>
    tpu.vector_store %arg4[%c0_7, %c0_8, %c0_9], %12 {strides = array<i32>} : memref<1x16x128xf32, #tpu.memory_space<vmem>>, vector<1x16x128xf32>,
    %c0_10 = arith.constant 0 : index
    %c0_11 = arith.constant 0 : index
    %c0_12 = arith.constant 0 : index
    %14 = vector.load %arg5[%c0_10, %c0_11, %c0_12] : memref<1x16x128xf32, #tpu.memory_space<vmem>>, vector<1x16x128xf32>
    %15 = vector.shape_cast %7 : vector<16x128xf32> to vector<1x16x128xf32>
    %cst_13 = arith.constant dense<0.000000e+00> : vector<16x128xf32>
    %16 = vector.multi_reduction <add>, %15, %cst_13 [0] : vector<1x16x128xf32> to vector<16x128xf32>
    %17 = vector.shape_cast %16 : vector<16x128xf32> to vector<1x16x128xf32>
    %18 = arith.addf %14, %17 : vector<1x16x128xf32>
    %c0_14 = arith.constant 0 : index
    %c0_15 = arith.constant 0 : index
    %c0_16 = arith.constant 0 : index
    %19 = vector.load %arg5[%c0_14, %c0_15, %c0_16] : memref<1x16x128xf32, #tpu.memory_space<vmem>>, vector<1x16x128xf32>
    tpu.vector_store %arg5[%c0_14, %c0_15, %c0_16], %18 {strides = array<i32>} : memref<1x16x128xf32, #tpu.memory_space<vmem>>, vector<1x16x128xf32>,
    return
  }
  func.func @transform_0(%arg0: i32, %arg1: i32) -> (i32, i32) {
    %c1_i32 = arith.constant 1 : i32
    %0 = arith.muli %arg0, %c1_i32 : i32
    %1 = arith.addi %0, %arg1 : i32
    %c0_i32 = arith.constant 0 : i32
    %c0_i32_0 = arith.constant 0 : i32
    return %1, %c0_i32 : i32, i32
  }
  func.func @transform_1(%arg0: i32, %arg1: i32) -> (i32, i32) {
    %c1_i32 = arith.constant 1 : i32
    %0 = arith.muli %arg0, %c1_i32 : i32
    %1 = arith.addi %0, %arg1 : i32
    %c0_i32 = arith.constant 0 : i32
    %c0_i32_0 = arith.constant 0 : i32
    return %1, %c0_i32 : i32, i32
  }
  func.func @transform_2(%arg0: i32, %arg1: i32) -> (i32, i32, i32) {
    %c0_i32 = arith.constant 0 : i32
    %c0_i32_0 = arith.constant 0 : i32
    %c0_i32_1 = arith.constant 0 : i32
    return %arg0, %c0_i32, %c0_i32_0 : i32, i32, i32
  }
  func.func @transform_3(%arg0: i32, %arg1: i32) -> (i32, i32, i32) {
    %c0_i32 = arith.constant 0 : i32
    %c0_i32_0 = arith.constant 0 : i32
    %c0_i32_1 = arith.constant 0 : i32
    return %arg0, %c0_i32, %c0_i32_0 : i32, i32, i32
  }
}

</mosaic_0001>

<bundles_post_ra>
// kernel: tpu_custom_call.1
= control target key start
LH: loop header
LB: loop body
LE: loop exit
PB: predicated region body
PF: predicated region fallthrough
CT: control target
= control target key end

     0   :  { %9 = vsyncpa [#allocation3], 0  ;;  %s292_s0 = inlined_call_operand.hbm [shape: f32[16,128], index: 0, kind: input, shape index: {}]   ;;  %s293_s1 = inlined_call_operand.hbm [shape: f32[16,128], index: 1, kind: input, shape index: {}]   ;;  %s294_s2 = inlined_call_operand.hbm [shape: f32[1,16,128], index: 2, kind: output, shape index: {0}]   ;;  %s295_s3 = inlined_call_operand.hbm [shape: f32[1,16,128], index: 3, kind: output, shape index: {1}]  }
   0x1   :  { %10 = vsyncpa [#allocation6], 0 }
   0x2   :  { %11 = vsyncpa [#allocation4], 0 }
   0x3   :  { %12 = vsyncpa [#allocation9], 0  ;;  %s21_s14 = sshll.u32 %s292_s0, 4  ;;  %s242_s15 = smov [#allocation2]   ;;  %s22_s14 = int_to_ptr.hbm [resolvable:$true] %s21_s14 }
   0x4   :  { %s23_s16 = sshll.u32 %s242_s15, 4  ;;  %s38_s19 = sshll.u32 %s293_s1, 4  ;;  %s24_s16 = int_to_ptr.vmem [resolvable:$true] %s23_s16  ;;  %s39_s19 = int_to_ptr.hbm [resolvable:$true] %s38_s19 }
   0x5   :  { %s243_s20 = smov 128   ;;  %s244_s21 = smov 8  }
   0x6   :  { %29 = dma.hbm_to_vmem [thread:$0]  %s22_s14, 256, %s24_s16, [#allocation3], %s243_s20, %s243_s20, %s244_s21  }
   0x7   :  { %s245_s22 = smov [#allocation5]  }
   0x8   :  { %s40_s23 = sshll.u32 %s245_s22, 4  ;;  %s41_s23 = int_to_ptr.vmem [resolvable:$true] %s40_s23 }
   0x9   :  { %46 = dma.hbm_to_vmem [thread:$0]  %s39_s19, 256, %s41_s23, [#allocation6], %s243_s20, %s243_s20, %s244_s21  }
   0xa   :  { %234 = dma.done.wait [#allocation3], 256  }
   0xb   :  { %235 = vsyncadd [#allocation3], 4294967040 }
   0xc   :  { %236 = dma.done.wait [#allocation6], 256  }
   0xd   :  { %237 = vsyncadd [#allocation6], 4294967040  ;;  %v67_v0 = vld [vmem:[#allocation2] sm:$0xff]  ;;  %v69_v1 = vld [vmem:[#allocation5] sm:$0xff]  ;;  %s246_s0 = smov [#allocation7]   ;;  %s99_s26 = sshll.u32 %s294_s2, 4  ;;  %s100_s26 = int_to_ptr.hbm [resolvable:$true] %s99_s26 }
   0xe   :  { %v68_v2 = vld [vmem:[#allocation2 + $0x8] sm:$0xff]  ;;  %v71_v3 = vsub.f32 %v67_v0, %v69_v1  ;;  %v70_v4 = vld [vmem:[#allocation5 + $0x8] sm:$0xff]  ;;  %s97_s1 = sshll.u32 %s246_s0, 4  ;;  %s247_s27 = smov [#allocation8]   ;;  %s98_s1 = int_to_ptr.vmem [resolvable:$true] %s97_s1 }
   0xf   :  { %v72_v5 = vsub.f32 %v68_v2, %v70_v4  ;;  %s110_s28 = sshll.u32 %s247_s27, 4  ;;  %s112_s4 = sshll.u32 %s295_s3, 4  ;;  %s111_s28 = int_to_ptr.vmem [resolvable:$true] %s110_s28  ;;  %s113_s4 = int_to_ptr.hbm [resolvable:$true] %s112_s4 }
  0x10   :  { %v73_v6 = vand.u32 2147483647, %v71_v3  ;;  %v75_v7 = vmul.f32 %v71_v3, %v71_v3 }
  0x11   :  { %v74_v8 = vand.u32 2147483647, %v72_v5  ;;  %v76_v9 = vmul.f32 %v72_v5, %v72_v5 }
  0x12   :  { %83 = vst [vmem:[#allocation7] sm:$0xff] %v73_v6 }
  0x13   :  { %84 = vst [vmem:[#allocation7 + $0x8] sm:$0xff] %v74_v8 }
  0x14   :  { %91 = vst [vmem:[#allocation8] sm:$0xff] %v75_v7  ;;  %105 = dma.vmem_to_hbm [thread:$0]  %s98_s1, 256, %s100_s26, [#allocation4], %s243_s20, %s243_s20, %s244_s21  }
  0x15   :  { %92 = vst [vmem:[#allocation8 + $0x8] sm:$0xff] %v76_v9 }
  0x16   :  { %118 = dma.vmem_to_hbm [thread:$0]  %s111_s28, 256, %s113_s4, [#allocation9], %s243_s20, %s243_s20, %s244_s21  }
  0x17   :  { %238 = dma.done.wait [#allocation4], 256  }
  0x18   :  { %239 = vsyncadd [#allocation4], 4294967040 }
  0x19   :  { %240 = dma.done.wait [#allocation9], 256  }
  0x1a   :  { %241 = vsyncadd [#allocation9], 4294967040 }
  0x1b   :  { %127 = vsyncpa [#allocation3], 1 }
  0x1c   :  { %128 = vsyncpa [#allocation6], 1 }
  0x1d   :  { %129 = vsyncpa [#allocation4], 1 }
  0x1e   :  { %130 = vsyncpa [#allocation9], 1 }

</bundles_post_ra>
